<compile_context>
chip_gen: v5e
topology: v5e:2x2
jax: 0.10.0
libtpu: 0.0.40
codegen_flags: <defaults>
</compile_context>

<pallas_src>
import functools

import jax
import jax.numpy as jnp
from jax.experimental import pallas as pl
from jax.experimental.pallas import tpu as pltpu


def _mhsa_kernel(*refs, head_num, vec_dim, has_pos, approx_recip):
    if has_pos:
        x_ref, wkqv_ref, bkqv_ref, wo_ref, bo_ref, pos_ref, o_ref = refs
    else:
        x_ref, wkqv_ref, bkqv_ref, wo_ref, bo_ref, o_ref = refs
        pos_ref = None

    H, D = head_num, vec_dim
    HD = H * D

    x = x_ref[...]                          # (TB, D, P) f32, natural layout
    TB, _, P = x.shape

    wkqv = wkqv_ref[...]                    # (3*HD, D)  1/sqrt(D) folded into Q rows
    bkqv = bkqv_ref[...]                    # (3*HD, 1)
    wo = wo_ref[...]                        # (D, HD)
    bo = bo_ref[...]                        # (D, 1)

    # --- Fused K/Q/V pointwise projection (Conv1d k=1), batched over b. -----
    # Broadcasting the tiny weight over b keeps this a clean batched
    # (3HD, D) x (D, P) matmul: batch dim leading, lhs contracts its minor
    # dim, rhs its second-minor dim, no hidden transposes.
    wkqv_b = jnp.broadcast_to(wkqv, (TB,) + wkqv.shape)            # (TB, 3HD, D)
    kqv = jnp.einsum("bod,bdp->bop", wkqv_b, x,
                     preferred_element_type=jnp.float32)
    kqv = kqv + bkqv[None, :, :]                                   # (TB, 3HD, P)

    # Row-split into k/q/v.  3HD -> (3, H, D) only splits the sublane axis
    # (full 8-row tiles when D == 8); the lane axis P is untouched, so no
    # lane relayout.  Heads merge into the leading batch axis.
    kqv = kqv.reshape(TB, 3, H, D, P)
    k = kqv[:, 0].reshape(TB * H, D, P)
    q = kqv[:, 1].reshape(TB * H, D, P)
    v = kqv[:, 2].reshape(TB * H, D, P)

    # --- Attention scores (scale already folded into Q weights/bias). -------
    # attn[g, i, j] = sum_d K[g, d, i] * Q[g, d, j]   (i = key, j = query)
    attn = jnp.einsum("gdi,gdj->gij", k, q,
                      preferred_element_type=jnp.float32)          # (G, P, P)
    if pos_ref is not None:
        attn = attn + pos_ref[...]                                 # (P, P) bias

    # --- Softmax over the key axis i (torch Softmax(dim=2) on [N,H,Pk,Pq]);
    #     normalization deferred until after the PV matmul. ------------------
    attn = attn - jnp.max(attn, axis=1, keepdims=True)
    e = jnp.exp(attn)                                              # un-normalized
    denom = jnp.sum(e, axis=1, keepdims=True)                      # (G, 1, P)

    # out_h[g, d, j] = (sum_i V[g, d, i] * e[g, i, j]) / denom[g, j]
    out_h = jnp.einsum("gdi,gij->gdj", v, e,
                       preferred_element_type=jnp.float32)         # (G, D, P)
    if approx_recip:
        out_h = out_h * pl.reciprocal(denom, approx=True)          # bcast over d
    else:
        out_h = out_h / denom

    # --- Head-merge projection (Conv1d k=1 over H*D channels). --------------
    multi = out_h.reshape(TB, HD, P)                               # tile-aligned
    wo_b = jnp.broadcast_to(wo, (TB,) + wo.shape)                  # (TB, D, HD)
    out = jnp.einsum("boc,bcp->bop", wo_b, multi,
                     preferred_element_type=jnp.float32)
    out = out + bo[None, :, :]                                     # (TB, D, P)
    o_ref[...] = out.astype(o_ref.dtype)


def _per_step_vmem_bytes(tb, d, p, h):
    """Rough f32 per-grid-step VMEM footprint: double-buffered I/O blocks,
    resident weights, and the main in-kernel temporaries."""
    hd = h * d
    io = 2 * 2 * tb * d * p                       # x + out blocks, 2 buffers each
    weights = 2 * (3 * hd * d + 3 * hd + d * hd + d + p * p)
    proj = 5 * tb * 3 * hd * p                    # kqv + k/q/v working copies
    scores = 3 * tb * h * p * p                   # attn, e, temporaries
    outh = 4 * tb * hd * p                        # out_h, multi, out
    return 4 * (io + weights + proj + scores + outh)


def _pick_tb(n, d, p, h, *, vmem_budget_bytes=8 << 20, prefer_steps=2):
    """Largest batch tile that fits the VMEM budget; prefer a `prefer_steps`-
    way split so v7x megacore can shard the (parallel) batch axis over both
    TensorCores.  Per-step fixed overhead is ~0.35 us, so the extra grid step
    costs almost nothing on single-TC chips (v5e/v6e)."""
    divisors = [t for t in range(1, n + 1) if n % t == 0]
    fitting = [t for t in divisors
               if _per_step_vmem_bytes(t, d, p, h) <= vmem_budget_bytes]
    if not fitting:
        return 1
    if prefer_steps and n % prefer_steps == 0 and (n // prefer_steps) in fitting:
        return n // prefer_steps
    return max(fitting)


def multi_head_sa(x, params, *, head_num, vec_dim, pos_mat=None,
                  approx_recip=True):
    """Forward pass of MultiHeadSA.  x: [N, D, P]; params: f32 weights/biases."""
    N, D, P = x.shape
    assert D == vec_dim
    scale = 1.0 / (float(vec_dim) ** 0.5)

    # Fuse K/Q/V into one projection; fold the 1/sqrt(D) attention scale into
    # the Q weights AND bias (the reference scales (Wq x + bq) as a whole).
    wkqv = jnp.concatenate(
        [params["wk"], params["wq"] * scale, params["wv"]], axis=0
    ).astype(jnp.float32)                                          # (3HD, D)
    bkqv = jnp.concatenate(
        [params["bk"], params["bq"] * scale, params["bv"]], axis=0
    ).astype(jnp.float32)                                          # (3HD, 1)
    wo = params["wo"].astype(jnp.float32)                          # (D, HD)
    bo = params["bo"].astype(jnp.float32)                          # (D, 1)

    tb = _pick_tb(N, D, P, head_num)
    vmem_limit = int(min(max(4 * _per_step_vmem_bytes(tb, D, P, head_num),
                             8 << 20), 32 << 20))

    has_pos = pos_mat is not None
    kernel = functools.partial(
        _mhsa_kernel, head_num=head_num, vec_dim=vec_dim,
        has_pos=has_pos, approx_recip=approx_recip)

    def full2d(arr):
        return pl.BlockSpec(arr.shape, lambda n: (0, 0))

    in_specs = [
        pl.BlockSpec((tb, D, P), lambda n: (n, 0, 0)),   # x, natural layout
        full2d(wkqv), full2d(bkqv),                      # fused KQV weights
        full2d(wo), full2d(bo),                          # head-merge weights
    ]
    args = [x, wkqv, bkqv, wo, bo]
    if has_pos:
        pos_mat = jnp.asarray(pos_mat, jnp.float32)
        assert pos_mat.shape == (P, P)
        in_specs.append(full2d(pos_mat))
        args.append(pos_mat)

    return pl.pallas_call(
        kernel,
        out_shape=jax.ShapeDtypeStruct((N, D, P), x.dtype),
        grid_spec=pltpu.PrefetchScalarGridSpec(
            num_scalar_prefetch=0,
            grid=(N // tb,),
            in_specs=in_specs,
            out_specs=pl.BlockSpec((tb, D, P), lambda n: (n, 0, 0)),
        ),
        compiler_params=pltpu.CompilerParams(
            dimension_semantics=("parallel",),
            vmem_limit_bytes=vmem_limit),
    )(*args)


def _reference(x, params, *, head_num, vec_dim, pos_mat=None):
    """Pure-JAX reference mirroring the PyTorch forward exactly."""
    N, D, P = x.shape
    H = head_num

    def conv1x1(w, b, inp):          # w: (O, I), b: (O, 1), inp: (N, I, P)
        return jnp.einsum("oi,nip->nop", w, inp) + b[None, :, :]

    k = conv1x1(params["wk"], params["bk"], x).reshape(N, H, D, P)
    q = conv1x1(params["wq"], params["bq"], x).reshape(N, H, D, P)
    v = conv1x1(params["wv"], params["bv"], x).reshape(N, H, D, P)
    kt = jnp.swapaxes(k, 2, 3)                        # (N, H, P, D)
    attn = jnp.einsum("nhid,nhdj->nhij", kt, q) / (vec_dim ** 0.5)
    if pos_mat is not None:
        attn = attn + pos_mat
    w = jax.nn.softmax(attn, axis=2)                  # softmax over key axis
    out = jnp.einsum("nhdi,nhij->nhdj", v, w).reshape(N, H * D, P)
    return conv1x1(params["wo"], params["bo"], out)


def _init_params(key, vec_dim, head_num):
    HD = head_num * vec_dim
    ks = jax.random.split(key, 8)
    s_in = 1.0 / (vec_dim ** 0.5)
    s_out = 1.0 / (HD ** 0.5)
    return {
        "wk": jax.random.uniform(ks[0], (HD, vec_dim), jnp.float32, -s_in, s_in),
        "bk": jax.random.uniform(ks[1], (HD, 1), jnp.float32, -s_in, s_in),
        "wq": jax.random.uniform(ks[2], (HD, vec_dim), jnp.float32, -s_in, s_in),
        "bq": jax.random.uniform(ks[3], (HD, 1), jnp.float32, -s_in, s_in),
        "wv": jax.random.uniform(ks[4], (HD, vec_dim), jnp.float32, -s_in, s_in),
        "bv": jax.random.uniform(ks[5], (HD, 1), jnp.float32, -s_in, s_in),
        "wo": jax.random.uniform(ks[6], (vec_dim, HD), jnp.float32, -s_out, s_out),
        "bo": jax.random.uniform(ks[7], (vec_dim, 1), jnp.float32, -s_out, s_out),
    }


if __name__ == "__main__":
    N, vec_dim, head_num, patch_num = 8, 8, 2, 32

    key = jax.random.PRNGKey(0)
    k_x, k_p, k_pos = jax.random.split(key, 3)
    x = jax.random.normal(k_x, (N, vec_dim, patch_num), dtype=jnp.float32)
    params = _init_params(k_p, vec_dim, head_num)

    # --- exact path (plain division for the softmax denom) -------------------
    ref = _reference(x, params, head_num=head_num, vec_dim=vec_dim)
    out = multi_head_sa(x, params, head_num=head_num, vec_dim=vec_dim,
                        approx_recip=False)
    out = jax.block_until_ready(out)
    assert out.shape == (N, vec_dim, patch_num)
    err = float(jnp.max(jnp.abs(out - ref)))
    assert jnp.allclose(out, ref, atol=2e-5, rtol=2e-5), err

    # --- fast path (EUP approx reciprocal, still all-f32) --------------------
    out_fast = multi_head_sa(x, params, head_num=head_num, vec_dim=vec_dim,
                             approx_recip=True)
    out_fast = jax.block_until_ready(out_fast)
    err_fast = float(jnp.max(jnp.abs(out_fast - ref)))
    assert jnp.allclose(out_fast, ref, atol=5e-3, rtol=5e-3), err_fast

    # --- optional additive position bias -------------------------------------
    pos = 0.1 * jax.random.normal(k_pos, (patch_num, patch_num), jnp.float32)
    ref_pos = _reference(x, params, head_num=head_num, vec_dim=vec_dim,
                         pos_mat=pos)
    out_pos = multi_head_sa(x, params, head_num=head_num, vec_dim=vec_dim,
                            pos_mat=pos, approx_recip=False)
    out_pos = jax.block_until_ready(out_pos)
    err_pos = float(jnp.max(jnp.abs(out_pos - ref_pos)))
    assert jnp.allclose(out_pos, ref_pos, atol=2e-5, rtol=2e-5), err_pos

    print("KERNEL_OK")
</pallas_src>

<mosaic_0001>
module attributes {stable_mosaic.version = 11 : i64} {
  func.func @_mhsa_kernel(%arg0: i32, %arg1: memref<4x8x32xf32, #tpu.memory_space<vmem>>, %arg2: memref<48x8xf32, #tpu.memory_space<vmem>>, %arg3: memref<48x1xf32, #tpu.memory_space<vmem>>, %arg4: memref<8x16xf32, #tpu.memory_space<vmem>>, %arg5: memref<8x1xf32, #tpu.memory_space<vmem>>, %arg6: memref<4x8x32xf32, #tpu.memory_space<vmem>>) attributes {dimension_semantics = [#tpu.dimension_semantics<parallel>], iteration_bounds = array<i64: 2>, scalar_prefetch = 0 : i64, scratch_operands = 0 : i64, tpu.core_type = #tpu.core_type<tc>, window_params = [{transform_indices = @transform_0, window_bounds = array<i64: 4, 8, 32>}, {pipeline_mode = #tpu.pipeline_mode<synchronous>, transform_indices = @transform_1, window_bounds = array<i64: 48, 8>}, {pipeline_mode = #tpu.pipeline_mode<synchronous>, transform_indices = @transform_2, window_bounds = array<i64: 48, 1>}, {pipeline_mode = #tpu.pipeline_mode<synchronous>, transform_indices = @transform_3, window_bounds = array<i64: 8, 16>}, {pipeline_mode = #tpu.pipeline_mode<synchronous>, transform_indices = @transform_4, window_bounds = array<i64: 8, 1>}, {transform_indices = @transform_5, window_bounds = array<i64: 4, 8, 32>}]} {
    %c0 = arith.constant 0 : index
    %c0_0 = arith.constant 0 : index
    %c0_1 = arith.constant 0 : index
    %0 = vector.load %arg1[%c0, %c0_0, %c0_1] : memref<4x8x32xf32, #tpu.memory_space<vmem>>, vector<4x8x32xf32>
    %c0_2 = arith.constant 0 : index
    %c0_3 = arith.constant 0 : index
    %1 = vector.load %arg2[%c0_2, %c0_3] : memref<48x8xf32, #tpu.memory_space<vmem>>, vector<48x8xf32>
    %c0_4 = arith.constant 0 : index
    %c0_5 = arith.constant 0 : index
    %2 = vector.load %arg3[%c0_4, %c0_5] : memref<48x1xf32, #tpu.memory_space<vmem>>, vector<48x1xf32>
    %c0_6 = arith.constant 0 : index
    %c0_7 = arith.constant 0 : index
    %3 = vector.load %arg4[%c0_6, %c0_7] : memref<8x16xf32, #tpu.memory_space<vmem>>, vector<8x16xf32>
    %c0_8 = arith.constant 0 : index
    %c0_9 = arith.constant 0 : index
    %4 = vector.load %arg5[%c0_8, %c0_9] : memref<8x1xf32, #tpu.memory_space<vmem>>, vector<8x1xf32>
    %5 = vector.shape_cast %1 : vector<48x8xf32> to vector<1x48x8xf32>
    %6 = vector.broadcast %5 : vector<1x48x8xf32> to vector<4x48x8xf32>
    "tpu.trace_start"() <{level = 10 : i32, message = "bod,bdp->bop"}> : () -> ()
    %cst = arith.constant dense<0.000000e+00> : vector<4x48x32xf32>
    %7 = tpu.matmul %6, %0, %cst {dimension_numbers = #tpu.dot_dimension_numbers<[2], [1], [1], [2], [0, 0, 0, 1, 1, 2], [0], [0]>} : vector<4x48x8xf32>, vector<4x8x32xf32>, vector<4x48x32xf32> -> vector<4x48x32xf32>
    "tpu.trace_stop"() : () -> ()
    %8 = vector.shape_cast %2 : vector<48x1xf32> to vector<1x48x1xf32>
    %9 = vector.broadcast %8 : vector<1x48x1xf32> to vector<4x48x32xf32>
    %10 = arith.addf %7, %9 : vector<4x48x32xf32>
    %11 = vector.shape_cast %10 : vector<4x48x32xf32> to vector<4x3x2x8x32xf32>
    %12 = vector.extract_strided_slice %11 {offsets = [0, 0, 0, 0, 0], sizes = [4, 1, 2, 8, 32], strides = [1, 1, 1, 1, 1]} : vector<4x3x2x8x32xf32> to vector<4x1x2x8x32xf32>
    %13 = vector.shape_cast %12 : vector<4x1x2x8x32xf32> to vector<4x2x8x32xf32>
    %14 = vector.shape_cast %13 : vector<4x2x8x32xf32> to vector<8x8x32xf32>
    %15 = vector.extract_strided_slice %11 {offsets = [0, 1, 0, 0, 0], sizes = [4, 1, 2, 8, 32], strides = [1, 1, 1, 1, 1]} : vector<4x3x2x8x32xf32> to vector<4x1x2x8x32xf32>
    %16 = vector.shape_cast %15 : vector<4x1x2x8x32xf32> to vector<4x2x8x32xf32>
    %17 = vector.shape_cast %16 : vector<4x2x8x32xf32> to vector<8x8x32xf32>
    %18 = vector.extract_strided_slice %11 {offsets = [0, 2, 0, 0, 0], sizes = [4, 1, 2, 8, 32], strides = [1, 1, 1, 1, 1]} : vector<4x3x2x8x32xf32> to vector<4x1x2x8x32xf32>
    %19 = vector.shape_cast %18 : vector<4x1x2x8x32xf32> to vector<4x2x8x32xf32>
    %20 = vector.shape_cast %19 : vector<4x2x8x32xf32> to vector<8x8x32xf32>
    "tpu.trace_start"() <{level = 10 : i32, message = "gdi,gdj->gij"}> : () -> ()
    %cst_10 = arith.constant dense<0.000000e+00> : vector<8x32x32xf32>
    %21 = tpu.matmul %14, %17, %cst_10 {dimension_numbers = #tpu.dot_dimension_numbers<[1], [1], [2], [2], [0, 0, 0, 2, 1, 2], [0], [0]>} : vector<8x8x32xf32>, vector<8x8x32xf32>, vector<8x32x32xf32> -> vector<8x32x32xf32>
    "tpu.trace_stop"() : () -> ()
    %cst_11 = arith.constant dense<0xFF800000> : vector<8x32xf32>
    %22 = vector.multi_reduction <maximumf>, %21, %cst_11 [1] : vector<8x32x32xf32> to vector<8x32xf32>
    %23 = vector.shape_cast %22 : vector<8x32xf32> to vector<8x1x32xf32>
    %24 = vector.broadcast %23 : vector<8x1x32xf32> to vector<8x32x32xf32>
    %25 = arith.subf %21, %24 : vector<8x32x32xf32>
    %26 = math.exp %25 : vector<8x32x32xf32>
    %cst_12 = arith.constant dense<0.000000e+00> : vector<8x32xf32>
    %27 = vector.multi_reduction <add>, %26, %cst_12 [1] : vector<8x32x32xf32> to vector<8x32xf32>
    %28 = vector.shape_cast %27 : vector<8x32xf32> to vector<8x1x32xf32>
    "tpu.trace_start"() <{level = 10 : i32, message = "gdi,gij->gdj"}> : () -> ()
    %cst_13 = arith.constant dense<0.000000e+00> : vector<8x8x32xf32>
    %29 = tpu.matmul %20, %26, %cst_13 {dimension_numbers = #tpu.dot_dimension_numbers<[2], [1], [1], [2], [0, 0, 0, 1, 1, 2], [0], [0]>} : vector<8x8x32xf32>, vector<8x32x32xf32>, vector<8x8x32xf32> -> vector<8x8x32xf32>
    "tpu.trace_stop"() : () -> ()
    %30 = vector.broadcast %28 : vector<8x1x32xf32> to vector<8x8x32xf32>
    %31 = arith.divf %29, %30 : vector<8x8x32xf32>
    %32 = vector.shape_cast %31 : vector<8x8x32xf32> to vector<4x16x32xf32>
    %33 = vector.shape_cast %3 : vector<8x16xf32> to vector<1x8x16xf32>
    %34 = vector.broadcast %33 : vector<1x8x16xf32> to vector<4x8x16xf32>
    "tpu.trace_start"() <{level = 10 : i32, message = "boc,bcp->bop"}> : () -> ()
    %cst_14 = arith.constant dense<0.000000e+00> : vector<4x8x32xf32>
    %35 = tpu.matmul %34, %32, %cst_14 {dimension_numbers = #tpu.dot_dimension_numbers<[2], [1], [1], [2], [0, 0, 0, 1, 1, 2], [0], [0]>} : vector<4x8x16xf32>, vector<4x16x32xf32>, vector<4x8x32xf32> -> vector<4x8x32xf32>
    "tpu.trace_stop"() : () -> ()
    %36 = vector.shape_cast %4 : vector<8x1xf32> to vector<1x8x1xf32>
    %37 = vector.broadcast %36 : vector<1x8x1xf32> to vector<4x8x32xf32>
    %38 = arith.addf %35, %37 : vector<4x8x32xf32>
    %c0_15 = arith.constant 0 : index
    %c0_16 = arith.constant 0 : index
    %c0_17 = arith.constant 0 : index
    %39 = vector.load %arg6[%c0_15, %c0_16, %c0_17] : memref<4x8x32xf32, #tpu.memory_space<vmem>>, vector<4x8x32xf32>
    tpu.vector_store %arg6[%c0_15, %c0_16, %c0_17], %38 {strides = array<i32>} : memref<4x8x32xf32, #tpu.memory_space<vmem>>, vector<4x8x32xf32>,
    return
  }
  func.func @transform_0(%arg0: i32) -> (i32, i32, i32) {
    %c0_i32 = arith.constant 0 : i32
    %c0_i32_0 = arith.constant 0 : i32
    %c0_i32_1 = arith.constant 0 : i32
    return %arg0, %c0_i32, %c0_i32_0 : i32, i32, i32
  }
  func.func @transform_1(%arg0: i32) -> (i32, i32) {
    %c0_i32 = arith.constant 0 : i32
    %c0_i32_0 = arith.constant 0 : i32
    %c0_i32_1 = arith.constant 0 : i32
    return %c0_i32, %c0_i32_0 : i32, i32
  }
  func.func @transform_2(%arg0: i32) -> (i32, i32) {
    %c0_i32 = arith.constant 0 : i32
    %c0_i32_0 = arith.constant 0 : i32
    %c0_i32_1 = arith.constant 0 : i32
    return %c0_i32, %c0_i32_0 : i32, i32
  }
  func.func @transform_3(%arg0: i32) -> (i32, i32) {
    %c0_i32 = arith.constant 0 : i32
    %c0_i32_0 = arith.constant 0 : i32
    %c0_i32_1 = arith.constant 0 : i32
    return %c0_i32, %c0_i32_0 : i32, i32
  }
  func.func @transform_4(%arg0: i32) -> (i32, i32) {
    %c0_i32 = arith.constant 0 : i32
    %c0_i32_0 = arith.constant 0 : i32
    %c0_i32_1 = arith.constant 0 : i32
    return %c0_i32, %c0_i32_0 : i32, i32
  }
  func.func @transform_5(%arg0: i32) -> (i32, i32, i32) {
    %c0_i32 = arith.constant 0 : i32
    %c0_i32_0 = arith.constant 0 : i32
    %c0_i32_1 = arith.constant 0 : i32
    return %arg0, %c0_i32, %c0_i32_0 : i32, i32, i32
  }
}

</mosaic_0001>

<bundles_post_ra>
// kernel: tpu_custom_call.1
= control target key start
LH: loop header
LB: loop body
LE: loop exit
PB: predicated region body
PF: predicated region fallthrough
CT: control target
= control target key end

     0   :  { %10 = vsyncpa [#allocation3], 0  ;;  %s2570_s0 = inlined_call_operand.vmem [shape: f32[8,8,32], index: 0, kind: input, shape index: {}]   ;;  %s2571_s1 = inlined_call_operand.vmem [shape: f32[48,8], index: 1, kind: input, shape index: {}]   ;;  %s2572_s2 = inlined_call_operand.vmem [shape: f32[48,1], index: 2, kind: input, shape index: {}]   ;;  %s2573_s3 = inlined_call_operand.vmem [shape: f32[8,16], index: 3, kind: input, shape index: {}]   ;;  %s2574_s4 = inlined_call_operand.vmem [shape: f32[8,1], index: 4, kind: input, shape index: {}]   ;;  %s2575_s5 = inlined_call_operand.hbm [shape: f32[8,8,32], index: 5, kind: output, shape index: {}]  }
   0x1   :  { %12 = vsyncpa [#allocation3 + $0x1], 0  ;;  %s2101_s18 = smov 0   ;;  %s2103_s19 = smov 0  }
   0x2   :  { %s2105_s20 = smov 0   ;;  %s2107_s21 = smov 0  }
   0x3 LB: > { %s2122_s22 = sadd.s32 4294967295, %s2066_s21   ;;  %s1797_s23 = sadd.s32 4294967294, %s2066_s21   ;;  %s2066_s21 = sphi %s2107_s21, %s2585_s21   ;;  %s2062_s20 = sphi %s2105_s20, %s2584_s20   ;;  %s2058_s19 = sphi %s2103_s19, %s2583_s19   ;;  %s2054_s18 = sphi %s2101_s18, %s2582_s18  }
   0x4   : > { %s2126_s24 = sadd.s32 1, %s2066_s21   ;;  %s135_s25 = sadd.s32 1, %s2062_s20 }
   0x5   : > { %s132_s26 = ssub.s32 %s2066_s21, %s2126_s24  ;;  %p145_p0 = scmp.ne.s32.totalorder %s2062_s20, %s2058_s19 }
   0x6   : > { %p133_p1 = scmp.eq.s32.totalorder %s132_s26, 0  ;;  %p146_p2 = scmp.eq.s32.totalorder %s2122_s22, 1 }
   0x7   : > { %p151_p3 = scmp.ne.s32.totalorder %s2058_s19, %s2054_s18  ;;  %p152_p4 = scmp.eq.s32.totalorder %s1797_s23, 1 }
   0x8   : > { %s2137_s27 = scalar_select %p133_p1, %s2062_s20, %s135_s25  }
   0x9   : > { %p2139_p5 = por %p146_p2, %p145_p0  ;;  %p2143_p6 = por %p152_p4, %p151_p3 }
   0xa   : > { %p1800_p7 = scmp.ge.s32.totalorder %s2066_s21, 1  ;;  %p191_p8 = scmp.lt.s32.totalorder %s2066_s21, 3 }
   0xc   : > { %p192_p9 = pnand %p1800_p7, %p191_p8 }
   0xd   : > { %s1802_s7 = sshll.u32 (!%p192_p9), %s2122_s22, 2  ;;  %s216_s6 = sand.u32 (!%p192_p9), 1, %s2058_s19  }
   0xe   : > { %195 = sbr.rel (%p192_p9) target bundleno = 856 (0x358), region = 40  ;;  %p220_p10 = scmp.lt.s32.totalorder (!%p192_p9), %s1802_s7, 7 }
   0xf   : > { %s1877_s9 = sshll.u32 (!%p192_p9), %s2122_s22, 5  ;;  %s1720_s15 = scalar_lea.sflag (!%p192_p9), [#allocation3], %s216_s6 }
  0x10   : > { %s1731_s12 = scalar_lea.hbm (!%p192_p9), %s2575_s5, %s1877_s9  ;;  %s2024_s25 = scalar_lea.hbm (!%p192_p9), %s2575_s5, 64 }
  0x11   : > { %s1734_s14 = sshll.u32 (!%p192_p9), %s1731_s12, 4  ;;  %s1735_s14 = int_to_ptr.hbm [resolvable:$true] %s1734_s14 }
  0x12   : > { %s2018_s16 = sshra.s32 (!%p192_p9), %s1735_s14, 4  ;;  %s2019_s16 = int_to_ptr.hbm [resolvable:$true] %s2018_s16 }
  0x13   : > { %v237_v0 = vld [vmem:[%s2572_s2 + $0x8] sm:$0xff]  ;;  %v2068_v1 = vmov 0   ;;  %v239_v2 = vld [vmem:[%s2572_s2 + $0x18] sm:$0xff]  ;;  %s2587_s7 = smov (!%p220_p10, %s1802_s7), 7  ;;  %v230_v3 = vld [vmem:[%s2571_s1] sm:$0xff]  ;;  %vm274_vm0 = vcmask 64512   ;;  %p2025_p0 = scmp.lt.s32.totalorder %s2019_s16, %s2575_s5 }
  0x14   : > { %1921 = vset.pattern.permute.xlu0 %v2068_v1  ;;  %1922 = vset.pattern.permute.xlu1 %v2068_v1  ;;  %s1803_s10 = sshll.u32 %s2587_s7, 3  ;;  %v236_v8 = vld [vmem:[%s2572_s2] sm:$0xff]  ;;  %v238_v9 = vld [vmem:[%s2572_s2 + $0x10] sm:$0xff]  ;;  %v231_v10 = vld [vmem:[%s2571_s1 + $0x8] sm:$0xff]  ;;  %vm1017_vm1 = vcmask 261120   ;;  %s1801_s7 = sshll.u32 %s216_s6, 5 }
  0x15   : > { %251 = vperm.xlu0 %1921, %v237_v0   ;;  %261 = vperm.xlu1 %1922, %v239_v2   ;;  %s223_s13 = scalar_lea.vmem %s2570_s0, %s1803_s10  ;;  %v232_v11 = vld [vmem:[%s2571_s1 + $0x10] sm:$0xff]  ;;  %v233_v12 = vld [vmem:[%s2571_s1 + $0x18] sm:$0xff]  ;;  %v234_v37 = vld [vmem:[%s2571_s1 + $0x20] sm:$0xff]  ;;  %s218_s8 = scalar_lea.vmem [#allocation2], %s1801_s7 }
  0x16   : > { %v226_v4 = vld [vmem:[%s223_s13] sm:$0xff]  ;;  %v227_v5 = vld [vmem:[%s223_s13 + $0x8] sm:$0xff]  ;;  %v228_v6 = vld [vmem:[%s223_s13 + $0x10] sm:$0xff]  ;;  %s2020_s17 = scalar_lea.hbm %s2019_s16, 32 }
  0x17   : > { %308 = vmatpush.msra.mxu0 %v226_v4  ;;  %343 = vmatpush.msra.mxu1 %v227_v5  ;;  %v229_v7 = vld [vmem:[%s223_s13 + $0x18] sm:$0xff]  ;;  %v235_v49 = vld [vmem:[%s2571_s1 + $0x28] sm:$0xff]  ;;  %v240_v51 = vld [vmem:[%s2572_s2 + $0x20] sm:$0xff]  ;;  %s1732_s13 = sshll.u32 %s218_s8, 4  ;;  %p2021_p11 = scmp.ne.s32.totalorder %s2019_s16, %s2020_s17  ;;  %s1733_s13 = int_to_ptr.vmem [resolvable:$true] %s1732_s13 }
  0x18   : > { %378 = vmatpush.msra.mxu2 %v228_v6  ;;  %413 = vmatpush.msra.mxu3 %v229_v7  ;;  %v241_v56 = vld [vmem:[%s2572_s2 + $0x28] sm:$0xff]  ;;  %p2026_p1 = scmp.lt.s32.totalorder %s2024_s25, %s2020_s17 }
  0x19   : > { %1804 = vmatmul.msk.f32.vlgmr.msra.gmra.mxu0 %vm274_vm0, %v230_v3  ;;  %1810 = vmatmul.msk.f32.vlgmr.msra.gmra.mxu1 %vm274_vm0, %v230_v3  ;;  %p2022_p12 = pnand %p2021_p11, %p2139_p5 }
  0x1a   : > { %1816 = vmatmul.msk.f32.vlgmr.msra.gmra.mxu2 %vm274_vm0, %v230_v3  ;;  %1822 = vmatmul.msk.f32.vlgmr.msra.gmra.mxu3 %vm274_vm0, %v230_v3  ;;  %p2027_p2 = por %p2026_p1, %p2025_p0 }
  0x1b   : > { %p2023_p13 = pneg %p2022_p12 }
  0x1d   : > { %246 = vperm.xlu0 %1921, %v236_v8   ;;  %256 = vperm.xlu1 %1922, %v238_v9   ;;  %p2028_p3 = pnand %p2027_p2, %p2023_p13 }
  0x21   : > { %1805 = vmatmul.msk.f32.gmra.mxu0 %vm274_vm0, %v231_v10  ;;  %1811 = vmatmul.msk.f32.gmra.mxu1 %vm274_vm0, %v231_v10 }
  0x22   : > { %1817 = vmatmul.msk.f32.gmra.mxu2 %vm274_vm0, %v231_v10  ;;  %1823 = vmatmul.msk.f32.gmra.mxu3 %vm274_vm0, %v231_v10 }
  0x29   : > { %1806 = vmatmul.msk.f32.gmra.mxu0 %vm274_vm0, %v232_v11  ;;  %1812 = vmatmul.msk.f32.gmra.mxu1 %vm274_vm0, %v232_v11 }
  0x2a   : > { %1818 = vmatmul.msk.f32.gmra.mxu2 %vm274_vm0, %v232_v11  ;;  %1824 = vmatmul.msk.f32.gmra.mxu3 %vm274_vm0, %v232_v11 }
  0x31   : > { %1807 = vmatmul.msk.f32.gmra.mxu0 %vm274_vm0, %v233_v12  ;;  %1813 = vmatmul.msk.f32.gmra.mxu1 %vm274_vm0, %v233_v12 }
  0x32   : > { %1819 = vmatmul.msk.f32.gmra.mxu2 %vm274_vm0, %v233_v12  ;;  %1825 = vmatmul.msk.f32.gmra.mxu3 %vm274_vm0, %v233_v12 }
  0x39   : > { %1808 = vmatmul.msk.f32.gmra.mxu0 %vm274_vm0, %v234_v37  ;;  %1814 = vmatmul.msk.f32.gmra.mxu1 %vm274_vm0, %v234_v37 }
  0x3a   : > { %1820 = vmatmul.msk.f32.gmra.mxu2 %vm274_vm0, %v234_v37  ;;  %1826 = vmatmul.msk.f32.gmra.mxu3 %vm274_vm0, %v234_v37 }
  0x41   : > { %1809 = vmatmul.msk.f32.gmra.mxu0 %vm274_vm0, %v235_v49  ;;  %1815 = vmatmul.msk.f32.gmra.mxu1 %vm274_vm0, %v235_v49 }
  0x42   : > { %1821 = vmatmul.msk.f32.gmra.mxu2 %vm274_vm0, %v235_v49  ;;  %1827 = vmatmul.msk.f32.gmra.mxu3 %vm274_vm0, %v235_v49 }
  0x87   : > { %v252_v13 = vpop.permute.xlu0 %251  ;;  %v262_v29 = vpop.permute.xlu1 %261 }
  0x8f   : > { %v247_v14 = vpop.permute.xlu0 %246  ;;  %v257_v35 = vpop.permute.xlu1 %256 }
  0x96   : > { %v310_v15 = vpop.f32.mrf.mxu0  ;;  %v345_v16 = vpop.f32.mrf.mxu1 }
  0x97   : > { %v311_v17 = vadd.f32 %v310_v15, %v247_v14  ;;  %v346_v18 = vadd.f32 %v345_v16, %v247_v14 }
  0x99   : > { %579 = vxpose.xlu2.b32.start.end [1/1] (short) (narrow) %v346_v18, 32  ;;  %433 = vxpose.xlu1.b32.start.end [1/1] (short) (narrow) %v311_v17, 32 }
  0x9d   : > { %v380_v21 = vpop.f32.mrf.mxu2  ;;  %v415_v26 = vpop.f32.mrf.mxu3 }
  0x9e   : > { %v313_v19 = vpop.f32.mrf.mxu0  ;;  %v348_v22 = vpop.f32.mrf.mxu1  ;;  %v416_v27 = vadd.f32 %v415_v26, %v247_v14  ;;  %v381_v50 = vadd.f32 %v380_v21, %v247_v14 }
  0x9f   : > { %v314_v20 = vadd.f32 %v313_v19, %v252_v13  ;;  %v349_v24 = vadd.f32 %v348_v22, %v252_v13 }
  0xa1   : > { %506 = vxpose.xlu0.b32.start.end [1/1] (short) (narrow) %v314_v20, 32 }
  0xa5   : > { %v383_v23 = vpop.f32.mrf.mxu2  ;;  %v418_v28 = vpop.f32.mrf.mxu3 }
  0xa6   : > { %v384_v25 = vadd.f32 %v383_v23, %v252_v13  ;;  %v316_v30 = vpop.f32.mrf.mxu0  ;;  %v351_v31 = vpop.f32.mrf.mxu1  ;;  %v419_v34 = vadd.f32 %v418_v28, %v252_v13 }
  0xa7   : > { %v317_v43 = vadd.f32 %v316_v30, %v257_v35  ;;  %v352_v47 = vadd.f32 %v351_v31, %v257_v35 }
  0xa9   : > { %492 = vmatpush.msrb.mxu0 %v317_v43  ;;  %638 = vmatpush.msrb.mxu2 %v352_v47 }
  0xad   : > { %v386_v32 = vpop.f32.mrf.mxu2  ;;  %v421_v33 = vpop.f32.mrf.mxu3 }
  0xae   : > { %v319_v36 = vpop.f32.mrf.mxu0  ;;  %v387_v38 = vadd.f32 %v386_v32, %v257_v35  ;;  %v422_v39 = vadd.f32 %v421_v33, %v257_v35  ;;  %v354_v41 = vpop.f32.mrf.mxu1 }
  0xaf   : > { %v320_v40 = vadd.f32 %v319_v36, %v262_v29  ;;  %v355_v44 = vadd.f32 %v354_v41, %v262_v29 }
  0xb0   : > { %784 = vmatpush.msra.mxu0 %v387_v38  ;;  %930 = vmatpush.msra.mxu2 %v422_v39 }
  0xb1   : > { %565 = vmatpush.msrb.mxu1 %v320_v40  ;;  %711 = vmatpush.msrb.mxu3 %v355_v44 }
  0xb5   : > { %v389_v42 = vpop.f32.mrf.mxu2  ;;  %v424_v46 = vpop.f32.mrf.mxu3 }
  0xb6   : > { %v390_v45 = vadd.f32 %v389_v42, %v262_v29  ;;  %v425_v48 = vadd.f32 %v424_v46, %v262_v29  ;;  %v2252_v23 = vpop.f32.mrf.mxu0 }
  0xb8   : > { %857 = vmatpush.msra.mxu1 %v390_v45  ;;  %1003 = vmatpush.msra.mxu3 %v425_v48 }
  0xb9   : > { %652 = vxpose.xlu2.b32.start.end [1/1] (short) (narrow) %v349_v24, 32  ;;  %798 = vxpose.xlu1.b32.start.end [1/1] (short) (narrow) %v384_v25, 32 }
  0xbd   : > { %v392_v19 = vpop.f32.mrf.mxu2 }
  0xbe   : > { %v2257_v26 = vpop.f32.mrf.mxu0 }
  0xc1   : > { %871 = vxpose.xlu0.b32.start.end [1/1] (short) (narrow) %v416_v27, 32  ;;  %v2259_v27 = vpop.f32.mrf.mxu1 }
  0xc5   : > { %v2255_v25 = vpop.f32.mrf.mxu2 }
  0xc9   : > { %v2261_v29 = vpop.f32.mrf.mxu1 }
  0xd9   : > { %944 = vxpose.xlu2.b32.start.end [1/1] (short) (narrow) %v419_v34, 32  ;;  %v2269_v34 = vpop.f32.mrf.mxu3 }
  0xe1   : > { %v2280_v45 = vpop.f32.mrf.mxu3 }
  0xf9   : > { %725 = vxpose.xlu2.b32.start.end [1/1] (short) (narrow) %v381_v50, 32 }
 0x12b   : > { %266 = vperm.xlu1 %1922, %v240_v51  }
 0x132   : > { %v595_v52 = vpop.trf.xlu2 }
 0x133   : > { %1836 = vmatmul.msk.f32.vlgmr.msrb.gmra.mxu2 %vm274_vm0, %v595_v52 }
 0x13a   : > { %v596_v53 = vpop.trf.xlu2 }
 0x13b   : > { %1837 = vmatmul.msk.f32.gmra.mxu2 %vm274_vm0, %v596_v53 }
 0x13d   : > { %v449_v54 = vpop.trf.xlu1 }
 0x13e   : > { %1828 = vmatmul.msk.f32.vlgmr.msrb.gmra.mxu0 %vm274_vm0, %v449_v54 }
 0x142   : > { %v597_v55 = vpop.trf.xlu2 }
 0x143   : > { %1838 = vmatmul.msk.f32.gmra.mxu2 %vm274_vm0, %v597_v55 }
 0x145   : > { %v522_v57 = vpop.trf.xlu0  ;;  %v450_v58 = vpop.trf.xlu1 }
 0x146   : > { %1829 = vmatmul.msk.f32.gmra.mxu0 %vm274_vm0, %v450_v58  ;;  %1832 = vmatmul.msk.f32.vlgmr.msrb.gmra.mxu1 %vm274_vm0, %v522_v57 }
 0x147   : > { %271 = vperm.xlu0 %1921, %v241_v56  }
 0x14a   : > { %v598_v59 = vpop.trf.xlu2 }
 0x14b   : > { %1839 = vmatmul.msk.f32.gmra.mxu2 %vm274_vm0, %v598_v59 }
 0x14d   : > { %v523_v60 = vpop.trf.xlu0  ;;  %v451_v61 = vpop.trf.xlu1 }
 0x14e   : > { %1830 = vmatmul.msk.f32.gmra.mxu0 %vm274_vm0, %v451_v61  ;;  %1833 = vmatmul.msk.f32.gmra.mxu1 %vm274_vm0, %v523_v60 }
 0x152   : > { %v668_v62 = vpop.trf.xlu2 }
 0x153   : > { %1840 = vmatmul.msk.f32.vlgmr.msrb.gmra.mxu3 %vm274_vm0, %v668_v62 }
 0x155   : > { %v524_v63 = vpop.trf.xlu0  ;;  %v452_v0 = vpop.trf.xlu1 }
 0x156   : > { %1831 = vmatmul.msk.f32.gmra.mxu0 %vm274_vm0, %v452_v0  ;;  %1834 = vmatmul.msk.f32.gmra.mxu1 %vm274_vm0, %v524_v63 }
 0x15a   : > { %v669_v2 = vpop.trf.xlu2 }
 0x15b   : > { %1841 = vmatmul.msk.f32.gmra.mxu3 %vm274_vm0, %v669_v2  ;;  %1923 = vset.pattern.permute.xlu2 %v2068_v1 }
 0x15d   : > { %v525_v3 = vpop.trf.xlu0  ;;  %v814_v4 = vpop.trf.xlu1 }
 0x15e   : > { %1835 = vmatmul.msk.f32.gmra.mxu1 %vm274_vm0, %v525_v3 }
 0x162   : > { %v670_v5 = vpop.trf.xlu2 }
 0x163   : > { %1842 = vmatmul.msk.f32.gmra.mxu3 %vm274_vm0, %v670_v5 }
 0x165   : > { %v887_v6 = vpop.trf.xlu0  ;;  %v815_v7 = vpop.trf.xlu1 }
 0x166   : > { %1848 = vmatmul.msk.f32.vlgmr.msra.gmra.mxu1 %vm274_vm0, %v814_v4  ;;  %1852 = vmatmul.msk.f32.vlgmr.msra.gmra.mxu2 %vm274_vm0, %v887_v6 }
 0x16a   : > { %v671_v8 = vpop.trf.xlu2 }
 0x16b   : > { %1843 = vmatmul.msk.f32.gmra.mxu3 %vm274_vm0, %v671_v8 }
 0x16d   : > { %v888_v9 = vpop.trf.xlu0  ;;  %v816_v1 = vpop.trf.xlu1 }
 0x16e   : > { %1849 = vmatmul.msk.f32.gmra.mxu1 %vm274_vm0, %v815_v7  ;;  %1853 = vmatmul.msk.f32.gmra.mxu2 %vm274_vm0, %v888_v9 }
 0x172   : > { %v960_v10 = vpop.trf.xlu2 }
 0x173   : > { %1856 = vmatmul.msk.f32.vlgmr.msra.gmra.mxu3 %vm274_vm0, %v960_v10 }
 0x175   : > { %v889_v11 = vpop.trf.xlu0  ;;  %v817_v13 = vpop.trf.xlu1 }
 0x176   : > { %1850 = vmatmul.msk.f32.gmra.mxu1 %vm274_vm0, %v816_v1  ;;  %1854 = vmatmul.msk.f32.gmra.mxu2 %vm274_vm0, %v889_v11 }
 0x17a   : > { %v961_v12 = vpop.trf.xlu2 }
 0x17b   : > { %1857 = vmatmul.msk.f32.gmra.mxu3 %vm274_vm0, %v961_v12 }
 0x17d   : > { %v890_v14 = vpop.trf.xlu0 }
 0x17e   : > { %1851 = vmatmul.msk.f32.gmra.mxu1 %vm274_vm0, %v817_v13  ;;  %1855 = vmatmul.msk.f32.gmra.mxu2 %vm274_vm0, %v890_v14 }
 0x182   : > { %v962_v15 = vpop.trf.xlu2 }
 0x183   : > { %1858 = vmatmul.msk.f32.gmra.mxu3 %vm274_vm0, %v962_v15 }
 0x18a   : > { %v963_v16 = vpop.trf.xlu2 }
 0x18b   : > { %1859 = vmatmul.msk.f32.gmra.mxu3 %vm274_vm0, %v963_v16 }
 0x192   : > { %v741_v17 = vpop.trf.xlu2 }
 0x193   : > { %1844 = vmatmul.msk.f32.vlgmr.msra.gmra.mxu0 %vm274_vm0, %v741_v17 }
 0x19a   : > { %v742_v18 = vpop.trf.xlu2 }
 0x19b   : > { %1845 = vmatmul.msk.f32.gmra.mxu0 %vm274_vm0, %v742_v18 }
 0x19d   : > { %v2246_v20 = vpop.permute.xlu1 %266 }
 0x19e   : > { %v2249_v21 = vadd.f32 %v392_v19, %v2246_v20 }
 0x1a2   : > { %v743_v22 = vpop.trf.xlu2 }
 0x1a3   : > { %1846 = vmatmul.msk.f32.gmra.mxu0 %vm274_vm0, %v743_v22 }
 0x1aa   : > { %v744_v24 = vpop.trf.xlu2 }
 0x1ab   : > { %1847 = vmatmul.msk.f32.gmra.mxu0 %vm274_vm0, %v744_v24 }
 0x1b6   : > { %v640_v28 = vpop.f32.mrf.mxu2 }
 0x1b7   : > { %v1044_v39 = vsel %vm1017_vm1, %v640_v28, -inf }
 0x1bb   : > { %v2263_v30 = vpop.f32.mrf.mxu0 }
 0x1bc   : > { %v1018_v37 = vsel %vm1017_vm1, %v2263_v30, -inf }
 0x1be   : > { %v643_v31 = vpop.f32.mrf.mxu2 }
 0x1bf   : > { %v1045_v36 = vsel %vm1017_vm1, %v643_v31, -inf }
 0x1c0   : > { %v1046_v43 = vmax.f32 %v1044_v39, %v1045_v36 }
 0x1c3   : > { %v2265_v32 = vpop.f32.mrf.mxu0  ;;  %v2267_v33 = vpop.f32.mrf.mxu1 }
 0x1c4   : > { %v1019_v38 = vsel %vm1017_vm1, %v2265_v32, -inf  ;;  %v1031_v52 = vsel %vm1017_vm1, %v2267_v33, -inf }
 0x1c5   : > { %v1020_v44 = vmax.f32 %v1018_v37, %v1019_v38 }
 0x1c6   : > { %v646_v35 = vpop.f32.mrf.mxu2 }
 0x1c7   : > { %v1047_v40 = vsel %vm1017_vm1, %v646_v35, -inf }
 0x1c8   : > { %v1048_v46 = vmax.f32 %v1046_v43, %v1047_v40 }
 0x1cb   : > { %v500_v41 = vpop.f32.mrf.mxu0  ;;  %v2278_v42 = vpop.f32.mrf.mxu1 }
 0x1cc   : > { %v1021_v47 = vsel %vm1017_vm1, %v500_v41, -inf  ;;  %v1032_v53 = vsel %vm1017_vm1, %v2278_v42, -inf }
 0x1cd   : > { %v1022_v51 = vmax.f32 %v1020_v44, %v1021_v47  ;;  %v1033_v59 = vmax.f32 %v1031_v52, %v1032_v53 }
 0x1ce   : > { %v649_v48 = vpop.f32.mrf.mxu2 }
 0x1cf   : > { %v1049_v49 = vsel %vm1017_vm1, %v649_v48, -inf }
 0x1d0   : > { %v1050_v50 = vmax.f32 %v1048_v46, %v1049_v49 }
 0x1d2   : > { %v1051_v54 = vrot.slane %v1050_v50, 4 }
 0x1d3   : > { %v503_v55 = vpop.f32.mrf.mxu0  ;;  %v2288_v56 = vpop.f32.mrf.mxu1 }
 0x1d4   : > { %v1052_v57 = vmax.f32 %v1050_v50, %v1051_v54  ;;  %v1023_v58 = vsel %vm1017_vm1, %v503_v55, -inf  ;;  %v1034_v62 = vsel %vm1017_vm1, %v2288_v56, -inf }
 0x1d5   : > { %v1024_v60 = vmax.f32 %v1022_v51, %v1023_v58  ;;  %v1035_v4 = vmax.f32 %v1033_v59, %v1034_v62 }
 0x1d6   : > { %v1053_v61 = vrot.slane %v1052_v57, 2  ;;  %v2293_v63 = vpop.f32.mrf.mxu3 }
 0x1d7   : > { %v1025_v0 = vrot.slane %v1024_v60, 4  ;;  %v1057_v52 = vsel %vm1017_vm1, %v2293_v63, -inf }
 0x1d8   : > { %v1054_v2 = vmax.f32 %v1052_v57, %v1053_v61 }
 0x1d9   : > { %v1026_v3 = vmax.f32 %v1024_v60, %v1025_v0 }
 0x1da   : > { %v1055_v5 = vrot.slane %v1054_v2, 1 }
 0x1db   : > { %v1027_v6 = vrot.slane %v1026_v3, 2  ;;  %v2295_v7 = vpop.f32.mrf.mxu1 }
 0x1dc   : > { %v1056_v8 = vmax.f32 %v1054_v2, %v1055_v5  ;;  %v1036_v9 = vsel %vm1017_vm1, %v2295_v7, -inf }
 0x1dd   : > { %v1028_v1 = vmax.f32 %v1026_v3, %v1027_v6  ;;  %v1037_v10 = vmax.f32 %v1035_v4, %v1036_v9 }
 0x1de   : > { %v1130_v11 = vsub.f32 %v640_v28, %v1056_v8  ;;  %v1131_v12 = vsub.f32 %v643_v31, %v1056_v8  ;;  %v1132_v13 = vsub.f32 %v646_v35, %v1056_v8  ;;  %v1133_v14 = vsub.f32 %v649_v48, %v1056_v8  ;;  %v2299_v15 = vpop.f32.mrf.mxu3 }
 0x1df   : > { %v1029_v16 = vrot.slane %v1028_v1, 1  ;;  %v1038_v17 = vrot.slane %v1037_v10, 4 }
 0x1e0   : > { %v1170_v18 = vmul.f32 1.442695, %v1130_v11  ;;  %v1172_v19 = vmul.f32 1.442695, %v1131_v12  ;;  %v1174_v22 = vmul.f32 1.442695, %v1132_v13 }
 0x1e1   : > { %v1176_v24 = vmul.f32 1.442695, %v1133_v14  ;;  %v1030_v36 = vmax.f32 %v1028_v1, %v1029_v16  ;;  %v1039_v37 = vmax.f32 %v1037_v10, %v1038_v17 }
 0x1e2   : > { %1924 = vpow2.f32 %v1170_v18 }
 0x1e3   : > { %1926 = vpow2.f32 %v1172_v19  ;;  %v1122_v38 = vsub.f32 %v2263_v30, %v1030_v36  ;;  %v1123_v39 = vsub.f32 %v2265_v32, %v1030_v36  ;;  %v1124_v28 = vsub.f32 %v500_v41, %v1030_v36  ;;  %v2303_v31 = vpop.f32.mrf.mxu1 }
 0x1e4   : > { %1928 = vpow2.f32 %v1174_v22  ;;  %v1125_v35 = vsub.f32 %v503_v55, %v1030_v36  ;;  %v1040_v40 = vrot.slane %v1039_v37, 2  ;;  %v1058_v32 = vsel %vm1017_vm1, %v2299_v15, -inf }
 0x1e5   : > { %1930 = vpow2.f32 %v1176_v24  ;;  %v1154_v43 = vmul.f32 1.442695, %v1122_v38  ;;  %v1156_v44 = vmul.f32 1.442695, %v1123_v39  ;;  %v1158_v46 = vmul.f32 1.442695, %v1124_v28 }
 0x1e6   : > { %v1160_v47 = vmul.f32 1.442695, %v1125_v35  ;;  %v1041_v48 = vmax.f32 %v1039_v37, %v1040_v40  ;;  %v2305_v49 = vpop.f32.mrf.mxu3  ;;  %v1059_v61 = vmax.f32 %v1057_v52, %v1058_v32  ;;  %v358_v24 = vadd.f32 %v2259_v27, %v2246_v20 }
 0x1e7   : > { %1932 = vpow2.f32 %v1154_v43  ;;  %v1060_v58 = vsel %vm1017_vm1, %v2305_v49, -inf  ;;  %v1083_v28 = vsel %vm1017_vm1, %v2303_v31, -inf }
 0x1e8   : > { %v1925_v50 = vpop.eup %1924  ;;  %1934 = vpow2.f32 %v1156_v44  ;;  %v1042_v30 = vrot.slane %v1041_v48, 1  ;;  %v1061_v9 = vmax.f32 %v1059_v61, %v1060_v58 }
 0x1e9   : > { %v1927_v41 = vpop.eup %1926  ;;  %v1244_v51 = vsel %vm1017_vm1, %v1925_v50, 0.0  ;;  %1936 = vpow2.f32 %v1158_v46  ;;  %v2312_v53 = vpop.f32.mrf.mxu2 }
 0x1ea   : > { %v1929_v54 = vpop.eup %1928  ;;  %v1245_v55 = vsel %vm1017_vm1, %v1927_v41, 0.0  ;;  %1938 = vpow2.f32 %v1160_v47  ;;  %v1043_v57 = vmax.f32 %v1041_v48, %v1042_v30  ;;  %v323_v48 = vadd.f32 %v2252_v23, %v2246_v20 }
 0x1eb   : > { %v1931_v59 = vpop.eup %1930  ;;  %v1246_v60 = vadd.f32 %v1245_v55, %v1244_v51  ;;  %v2317_v62 = vpop.f32.mrf.mxu1  ;;  %v1247_v0 = vsel %vm1017_vm1, %v1929_v54, 0.0  ;;  %v1096_v55 = vsel %vm1017_vm1, %v2312_v53, -inf }
 0x1ec   : > { %v1126_v2 = vsub.f32 %v2267_v33, %v1043_v57  ;;  %v1127_v3 = vsub.f32 %v2278_v42, %v1043_v57  ;;  %v1128_v4 = vsub.f32 %v2288_v56, %v1043_v57  ;;  %1383 = vmatpush.msrb.mxu2 %v1931_v59  ;;  %v1129_v8 = vsub.f32 %v2295_v7, %v1043_v57 }
 0x1ed   : > { %v1933_v5 = vpop.eup %1932  ;;  %v1248_v6 = vadd.f32 %v1247_v0, %v1246_v60  ;;  %v1249_v10 = vsel %vm1017_vm1, %v1931_v59, 0.0  ;;  %v1084_v35 = vsel %vm1017_vm1, %v2317_v62, -inf }
 0x1ee   : > { %v1935_v1 = vpop.eup %1934  ;;  %v1218_v11 = vsel %vm1017_vm1, %v1933_v5, 0.0  ;;  %v1162_v12 = vmul.f32 1.442695, %v1126_v2  ;;  %v1164_v13 = vmul.f32 1.442695, %v1127_v3  ;;  %1384 = vmatpush.msrb.mxu2 %v1929_v54  ;;  %v2326_v14 = vpop.f32.mrf.mxu3  ;;  %v1085_v44 = vmax.f32 %v1083_v28, %v1084_v35 }
 0x1ef   : > { %v1937_v33 = vpop.eup %1936  ;;  %v2328_v42 = vadd.f32 %v1249_v10, %v1248_v6  ;;  %v1219_v56 = vsel %vm1017_vm1, %v1935_v1, 0.0  ;;  %v1166_v16 = vmul.f32 1.442695, %v1128_v4  ;;  %v1168_v17 = vmul.f32 1.442695, %v1129_v8  ;;  %v2365_v3 = vpop.permute.xlu0 %271 }
 0x1f0   : > { %v1939_v18 = vpop.eup %1938  ;;  %v1220_v7 = vadd.f32 %v1219_v56, %v1218_v11  ;;  %v1221_v19 = vsel %vm1017_vm1, %v1937_v33, 0.0  ;;  %1940 = vpow2.f32 %v1162_v12  ;;  %1385 = vmatpush.msrb.mxu2 %v1927_v41  ;;  %v1062_v22 = vsel %vm1017_vm1, %v2326_v14, -inf }
 0x1f1   : > { %v1223_v36 = vsel %vm1017_vm1, %v1939_v18, 0.0  ;;  %1942 = vpow2.f32 %v1164_v13  ;;  %v1063_v37 = vmax.f32 %v1061_v9, %v1062_v22  ;;  %1337 = vmatpush.msrb.mxu0 %v1939_v18  ;;  %v2337_v38 = vpop.f32.mrf.mxu2  ;;  %v326_v13 = vadd.f32 %v2257_v26, %v2365_v3 }
 0x1f2   : > { %v1222_v39 = vadd.f32 %v1221_v19, %v1220_v7  ;;  %1944 = vpow2.f32 %v1166_v16  ;;  %1386 = vmatpush.msrb.mxu2 %v1925_v50  ;;  %v1097_v57 = vsel %vm1017_vm1, %v2337_v38, -inf }
 0x1f3   : > { %1946 = vpow2.f32 %v1168_v17  ;;  %v1064_v40 = vrot.slane %v1063_v37, 4  ;;  %1338 = vmatpush.msrb.mxu0 %v1937_v33  ;;  %1862 = vmatmul.msk.f32.vlgmr.msrb.gmra.mxu2 %vm1017_vm1, %v358_v24  ;;  %v2344_v27 = vpop.f32.mrf.mxu1  ;;  %v1098_v6 = vmax.f32 %v1096_v55, %v1097_v57 }
 0x1f4   : > { %v2346_v43 = vadd.f32 %v1223_v36, %v1222_v39  ;;  %v1086_v30 = vsel %vm1017_vm1, %v2344_v27, -inf }
 0x1f5   : > { %v1065_v46 = vmax.f32 %v1063_v37, %v1064_v40  ;;  %1339 = vmatpush.msrb.mxu0 %v1935_v1  ;;  %v1087_v61 = vmax.f32 %v1085_v44, %v1086_v30 }
 0x1f6   : > { %v1941_v47 = vpop.eup %1940  ;;  %v2352_v50 = vpop.f32.mrf.mxu3 }
 0x1f7   : > { %v1943_v32 = vpop.eup %1942  ;;  %v1231_v41 = vsel %vm1017_vm1, %v1941_v47, 0.0  ;;  %v1066_v51 = vrot.slane %v1065_v46, 2  ;;  %1340 = vmatpush.msrb.mxu0 %v1933_v5 }
 0x1f8   : > { %v1945_v52 = vpop.eup %1944  ;;  %v1232_v54 = vsel %vm1017_vm1, %v1943_v32, 0.0  ;;  %1860 = vmatmul.msk.f32.vlgmr.msrb.gmra.mxu0 %vm1017_vm1, %v323_v48  ;;  %v1109_v48 = vsel %vm1017_vm1, %v2352_v50, -inf }
 0x1f9   : > { %v1947_v23 = vpop.eup %1946  ;;  %v1233_v58 = vadd.f32 %v1232_v54, %v1231_v41  ;;  %v1234_v59 = vsel %vm1017_vm1, %v1945_v52, 0.0  ;;  %v1067_v60 = vmax.f32 %v1065_v46, %v1066_v51  ;;  %v2362_v0 = vpop.f32.mrf.mxu2 }
 0x1fa   : > { %v1236_v2 = vsel %vm1017_vm1, %v1947_v23, 0.0  ;;  %1360 = vmatpush.msrb.mxu1 %v1947_v23  ;;  %v1099_v9 = vsel %vm1017_vm1, %v2362_v0, -inf }
 0x1fb   : > { %v1235_v4 = vadd.f32 %v1234_v59, %v1233_v58  ;;  %v1068_v5 = vrot.slane %v1067_v60, 1  ;;  %v2367_v8 = vpop.f32.mrf.mxu1  ;;  %v1100_v18 = vmax.f32 %v1098_v6, %v1099_v9 }
 0x1fc   : > { %1361 = vmatpush.msrb.mxu1 %v1945_v52  ;;  %v1088_v1 = vsel %vm1017_vm1, %v2367_v8, -inf }
 0x1fd   : > { %v2373_v10 = vadd.f32 %v1236_v2, %v1235_v4  ;;  %v1069_v11 = vmax.f32 %v1067_v60, %v1068_v5  ;;  %v1089_v12 = vmax.f32 %v1087_v61, %v1088_v1 }
 0x1fe   : > { %1362 = vmatpush.msrb.mxu1 %v1943_v32  ;;  %v2377_v33 = vpop.f32.mrf.mxu3 }
 0x1ff   : > { %v1134_v56 = vsub.f32 %v2293_v63, %v1069_v11  ;;  %v1135_v16 = vsub.f32 %v2299_v15, %v1069_v11  ;;  %v1136_v17 = vsub.f32 %v2305_v49, %v1069_v11  ;;  %v1137_v7 = vsub.f32 %v2326_v14, %v1069_v11 }
 0x200   : > { %v1090_v19 = vrot.slane %v1089_v12, 4  ;;  %1363 = vmatpush.msrb.mxu1 %v1941_v47  ;;  %v1110_v40 = vsel %vm1017_vm1, %v2377_v33, -inf }
 0x201   : > { %v1178_v22 = vmul.f32 1.442695, %v1134_v56  ;;  %v1180_v24 = vmul.f32 1.442695, %v1135_v16  ;;  %v1182_v36 = vmul.f32 1.442695, %v1136_v17  ;;  %1861 = vmatmul.msk.f32.vlgmr.msrb.gmra.mxu1 %vm1017_vm1, %v326_v13  ;;  %v2384_v26 = vpop.f32.mrf.mxu2  ;;  %v1111_v54 = vmax.f32 %v1109_v48, %v1110_v40 }
 0x202   : > { %v1184_v37 = vmul.f32 1.442695, %v1137_v7  ;;  %v1091_v39 = vmax.f32 %v1089_v12, %v1090_v19  ;;  %v1101_v63 = vsel %vm1017_vm1, %v2384_v26, -inf }
 0x203   : > { %1948 = vpow2.f32 %v1178_v22  ;;  %v1102_v15 = vmax.f32 %v1100_v18, %v1101_v63 }
 0x204   : > { %1950 = vpow2.f32 %v1180_v24  ;;  %v1092_v49 = vrot.slane %v1091_v39, 2  ;;  %v361_v24 = vadd.f32 %v2261_v29, %v2365_v3 }
 0x205   : > { %1952 = vpow2.f32 %v1182_v36  ;;  %v1103_v14 = vrot.slane %v1102_v15, 4 }
 0x206   : > { %1954 = vpow2.f32 %v1184_v37  ;;  %v1093_v28 = vmax.f32 %v1091_v39, %v1092_v49  ;;  %v2388_v35 = vpop.f32.mrf.mxu3 }
 0x207   : > { %v1104_v44 = vmax.f32 %v1102_v15, %v1103_v14  ;;  %v1112_v32 = vsel %vm1017_vm1, %v2388_v35, -inf }
 0x208   : > { %v1094_v46 = vrot.slane %v1093_v28, 1  ;;  %v1113_v2 = vmax.f32 %v1111_v54, %v1112_v32 }
 0x209   : > { %v1949_v47 = vpop.eup %1948  ;;  %v1105_v30 = vrot.slane %v1104_v44, 2 }
 0x20a   : > { %v1951_v41 = vpop.eup %1950  ;;  %v1257_v51 = vsel %vm1017_vm1, %v1949_v47, 0.0  ;;  %v1095_v52 = vmax.f32 %v1093_v28, %v1094_v46 }
 0x20b   : > { %v1953_v55 = vpop.eup %1952  ;;  %v1258_v57 = vsel %vm1017_vm1, %v1951_v41, 0.0  ;;  %v1106_v23 = vmax.f32 %v1104_v44, %v1105_v30 }
 0x20c   : > { %v1955_v58 = vpop.eup %1954  ;;  %v1259_v59 = vadd.f32 %v1258_v57, %v1257_v51  ;;  %v1142_v60 = vsub.f32 %v2303_v31, %v1095_v52  ;;  %v1143_v61 = vsub.f32 %v2317_v62, %v1095_v52  ;;  %v1260_v4 = vsel %vm1017_vm1, %v1953_v55, 0.0 }
 0x20d   : > { %v1144_v5 = vsub.f32 %v2344_v27, %v1095_v52  ;;  %v1145_v6 = vsub.f32 %v2367_v8, %v1095_v52  ;;  %v1107_v9 = vrot.slane %v1106_v23, 1  ;;  %1406 = vmatpush.msrb.mxu3 %v1955_v58  ;;  %v1262_v11 = vsel %vm1017_vm1, %v1955_v58, 0.0 }
 0x20e   : > { %v1261_v1 = vadd.f32 %v1260_v4, %v1259_v59  ;;  %v1194_v12 = vmul.f32 1.442695, %v1142_v60  ;;  %v1196_v13 = vmul.f32 1.442695, %v1143_v61  ;;  %v2404_v56 = vpop.f32.mrf.mxu3 }
 0x20f   : > { %v1198_v16 = vmul.f32 1.442695, %v1144_v5  ;;  %v1200_v31 = vmul.f32 1.442695, %v1145_v6  ;;  %v1108_v17 = vmax.f32 %v1106_v23, %v1107_v9  ;;  %1407 = vmatpush.msrb.mxu3 %v1953_v55  ;;  %v1114_v62 = vsel %vm1017_vm1, %v2404_v56, -inf }
 0x210   : > { %v2408_v18 = vadd.f32 %v1262_v11, %v1261_v1  ;;  %1956 = vpow2.f32 %v1194_v12  ;;  %v1115_v27 = vmax.f32 %v1113_v2, %v1114_v62  ;;  %v2410_v8 = vpop.f32.mrf.mxu0  ;;  %v396_v5 = vadd.f32 %v2255_v25, %v2365_v3 }
 0x211   : > { %1958 = vpow2.f32 %v1196_v13  ;;  %v1146_v7 = vsub.f32 %v2312_v53, %v1108_v17  ;;  %v1147_v19 = vsub.f32 %v2337_v38, %v1108_v17  ;;  %v1148_v22 = vsub.f32 %v2362_v0, %v1108_v17  ;;  %1408 = vmatpush.msrb.mxu3 %v1951_v41 }
 0x212   : > { %1960 = vpow2.f32 %v1198_v16  ;;  %v1149_v36 = vsub.f32 %v2384_v26, %v1108_v17  ;;  %v1116_v37 = vrot.slane %v1115_v27, 4 }
 0x213   : > { %1962 = vpow2.f32 %v1200_v31  ;;  %v1202_v39 = vmul.f32 1.442695, %v1146_v7  ;;  %v1204_v63 = vmul.f32 1.442695, %v1147_v19  ;;  %v1206_v15 = vmul.f32 1.442695, %v1148_v22  ;;  %1409 = vmatpush.msrb.mxu3 %v1949_v47 }
 0x214   : > { %v1208_v49 = vmul.f32 1.442695, %v1149_v36  ;;  %v1117_v14 = vmax.f32 %v1115_v27, %v1116_v37  ;;  %1863 = vmatmul.msk.f32.vlgmr.msrb.gmra.mxu3 %vm1017_vm1, %v361_v24 }
 0x215   : > { %1964 = vpow2.f32 %v1202_v39 }
 0x216   : > { %v1957_v53 = vpop.eup %1956  ;;  %1966 = vpow2.f32 %v1204_v63  ;;  %v1118_v38 = vrot.slane %v1117_v14, 2 }
 0x217   : > { %v1959_v0 = vpop.eup %1958  ;;  %v1283_v29 = vsel %vm1017_vm1, %v1957_v53, 0.0  ;;  %1968 = vpow2.f32 %v1206_v15 }
 0x218   : > { %v1961_v28 = vpop.eup %1960  ;;  %v1284_v26 = vsel %vm1017_vm1, %v1959_v0, 0.0  ;;  %1970 = vpow2.f32 %v1208_v49  ;;  %v1119_v40 = vmax.f32 %v1117_v14, %v1118_v38  ;;  %v2421_v44 = vpop.f32.mrf.mxu0 }
 0x219   : > { %v1963_v46 = vpop.eup %1962  ;;  %v1285_v47 = vadd.f32 %v1284_v26, %v1283_v29  ;;  %v1286_v48 = vsel %vm1017_vm1, %v1961_v28, 0.0  ;;  %v1071_v25 = vsel %vm1017_vm1, %v2421_v44, -inf }
 0x21a   : > { %v1288_v30 = vsel %vm1017_vm1, %v1963_v46, 0.0  ;;  %v1120_v32 = vrot.slane %v1119_v40, 1  ;;  %1452 = vmatpush.msra.mxu1 %v1963_v46 }
 0x21b   : > { %v1965_v41 = vpop.eup %1964  ;;  %v1287_v51 = vadd.f32 %v1286_v48, %v1285_v47 }
 0x21c   : > { %v1967_v52 = vpop.eup %1966  ;;  %v1296_v54 = vsel %vm1017_vm1, %v1965_v41, 0.0  ;;  %v1121_v55 = vmax.f32 %v1119_v40, %v1120_v32  ;;  %1453 = vmatpush.msra.mxu1 %v1961_v28  ;;  %v431_v28 = vadd.f32 %v2280_v45, %v2365_v3 }
 0x21d   : > { %v1969_v57 = vpop.eup %1968  ;;  %v2426_v23 = vadd.f32 %v1288_v30, %v1287_v51  ;;  %v1297_v58 = vsel %vm1017_vm1, %v1967_v52, 0.0 }
 0x21e   : > { %v1971_v59 = vpop.eup %1970  ;;  %v1298_v60 = vadd.f32 %v1297_v58, %v1296_v54  ;;  %v1299_v61 = vsel %vm1017_vm1, %v1969_v57, 0.0  ;;  %v1150_v2 = vsub.f32 %v2352_v50, %v1121_v55  ;;  %v1151_v4 = vsub.f32 %v2377_v33, %v1121_v55  ;;  %1454 = vmatpush.msra.mxu1 %v1959_v0 }
 0x21f   : > { %v1301_v6 = vsel %vm1017_vm1, %v1971_v59, 0.0  ;;  %v1152_v9 = vsub.f32 %v2388_v35, %v1121_v55  ;;  %v1153_v1 = vsub.f32 %v2404_v56, %v1121_v55  ;;  %1475 = vmatpush.msra.mxu2 %v1971_v59  ;;  %v428_v35 = vadd.f32 %v2269_v34, %v2246_v20 }
 0x220   : > { %v1300_v11 = vadd.f32 %v1299_v61, %v1298_v60  ;;  %v1210_v12 = vmul.f32 1.442695, %v1150_v2  ;;  %v1212_v13 = vmul.f32 1.442695, %v1151_v4  ;;  %1455 = vmatpush.msra.mxu1 %v1957_v53  ;;  %v792_v16 = vpop.f32.mrf.mxu0  ;;  %v1070_v56 = vsel %vm1017_vm1, %v2410_v8, -inf }
 0x221   : > { %v1214_v31 = vmul.f32 1.442695, %v1152_v9  ;;  %v1216_v50 = vmul.f32 1.442695, %v1153_v1  ;;  %1865 = vmatmul.msk.f32.vlgmr.msra.gmra.mxu1 %vm1017_vm1, %v396_v5  ;;  %1476 = vmatpush.msra.mxu2 %v1969_v57  ;;  %v1073_v17 = vsel %vm1017_vm1, %v792_v16, -inf  ;;  %v1072_v62 = vmax.f32 %v1070_v56, %v1071_v25 }
 0x222   : > { %v2438_v33 = vadd.f32 %v1301_v6, %v1300_v11  ;;  %1972 = vpow2.f32 %v1210_v12  ;;  %v1238_v4 = vrot.slane %v2373_v10, 4  ;;  %v1225_v5 = vrot.slane %v2346_v43, 4 }
 0x223   : > { %1974 = vpow2.f32 %v1212_v13  ;;  %1477 = vmatpush.msra.mxu2 %v1967_v52  ;;  %v1074_v7 = vmax.f32 %v1072_v62, %v1073_v17  ;;  %v1251_v56 = vrot.slane %v2328_v42, 4  ;;  %v1290_v62 = vrot.slane %v2426_v23, 4 }
 0x224   : > { %1976 = vpow2.f32 %v1214_v31  ;;  %v1239_v6 = vadd.f32 %v1238_v4, %v2373_v10  ;;  %v1226_v9 = vadd.f32 %v1225_v5, %v2346_v43 }
 0x225   : > { %1978 = vpow2.f32 %v1216_v50  ;;  %1478 = vmatpush.msra.mxu2 %v1965_v41  ;;  %v1252_v10 = vadd.f32 %v1251_v56, %v2328_v42 }
 0x226   : > { %1866 = vmatmul.msk.f32.vlgmr.msra.gmra.mxu2 %vm1017_vm1, %v428_v35  ;;  %v1240_v1 = vrot.slane %v1239_v6, 2  ;;  %v1227_v11 = vrot.slane %v1226_v9, 2  ;;  %v1264_v35 = vrot.slane %v2408_v18, 4 }
 0x228   : > { %v1973_v27 = vpop.eup %1972  ;;  %v795_v19 = vpop.f32.mrf.mxu0  ;;  %v1241_v12 = vadd.f32 %v1240_v1, %v1239_v6  ;;  %v1228_v13 = vadd.f32 %v1227_v11, %v1226_v9 }
 0x229   : > { %v1975_v22 = vpop.eup %1974  ;;  %v1309_v24 = vsel %vm1017_vm1, %v1973_v27, 0.0  ;;  %v1075_v36 = vsel %vm1017_vm1, %v795_v19, -inf }
 0x22a   : > { %v1977_v20 = vpop.eup %1976  ;;  %v1310_v34 = vsel %vm1017_vm1, %v1975_v22, 0.0  ;;  %v1076_v37 = vmax.f32 %v1074_v7, %v1075_v36  ;;  %v1229_v31 = vrot.slane %v1228_v13, 1 }
 0x22b   : > { %v1979_v39 = vpop.eup %1978  ;;  %v1311_v63 = vadd.f32 %v1310_v34, %v1309_v24  ;;  %v1312_v15 = vsel %vm1017_vm1, %v1977_v20, 0.0  ;;  %v1291_v24 = vadd.f32 %v1290_v62, %v2426_v23 }
 0x22c   : > { %v1077_v49 = vrot.slane %v1076_v37, 4  ;;  %1498 = vmatpush.msra.mxu3 %v1979_v39  ;;  %v1314_v53 = vsel %vm1017_vm1, %v1979_v39, 0.0  ;;  %v1230_v25 = vadd.f32 %v1229_v31, %v1228_v13 }
 0x22d   : > { %v1313_v14 = vadd.f32 %v1312_v15, %v1311_v63  ;;  %v1292_v39 = vrot.slane %v1291_v24, 2 }
 0x22e   : > { %v1078_v38 = vmax.f32 %v1076_v37, %v1077_v49  ;;  %1499 = vmatpush.msra.mxu3 %v1977_v20  ;;  %vm1511_vm3 = vweird.f32 %v1230_v25 }
 0x22f   : > { %v2453_v0 = vadd.f32 %v1314_v53, %v1313_v14  ;;  %v1293_v14 = vadd.f32 %v1292_v39, %v1291_v24 }
 0x230   : > { %v1079_v29 = vrot.slane %v1078_v38, 2  ;;  %1500 = vmatpush.msra.mxu3 %v1975_v22 }
 0x232   : > { %v1080_v26 = vmax.f32 %v1078_v38, %v1079_v29  ;;  %1501 = vmatpush.msra.mxu3 %v1973_v27 }
 0x233   : > { %1867 = vmatmul.msk.f32.vlgmr.msra.gmra.mxu3 %vm1017_vm1, %v431_v28 }
 0x234   : > { %v1081_v40 = vrot.slane %v1080_v26, 1 }
 0x236   : > { %v1082_v46 = vmax.f32 %v1080_v26, %v1081_v40  ;;  %v1294_v26 = vrot.slane %v1293_v14, 1  ;;  %v1517_v40 = vand.u32 2147483648, %v1230_v25 }
 0x238   : > { %v1138_v47 = vsub.f32 %v2410_v8, %v1082_v46  ;;  %v1139_v48 = vsub.f32 %v2421_v44, %v1082_v46  ;;  %v1140_v30 = vsub.f32 %v792_v16, %v1082_v46  ;;  %v1141_v32 = vsub.f32 %v795_v19, %v1082_v46 }
 0x239   : > { %v1242_v16 = vrot.slane %v1241_v12, 1  ;;  %v1253_v19 = vrot.slane %v1252_v10, 2  ;;  %v1515_v46 = vand.u32 2147483647, %v1230_v25 }
 0x23a   : > { %v1186_v41 = vmul.f32 1.442695, %v1138_v47  ;;  %v1188_v51 = vmul.f32 1.442695, %v1139_v48  ;;  %v1190_v52 = vmul.f32 1.442695, %v1140_v30 }
 0x23b   : > { %v1192_v54 = vmul.f32 1.442695, %v1141_v32  ;;  %v1243_v50 = vadd.f32 %v1242_v16, %v1241_v12  ;;  %v1254_v34 = vadd.f32 %v1253_v19, %v1252_v10  ;;  %vm1516_vm9 = vcmp.eq.f32.partialorder %v1515_v46, 8.507059e+37 }
 0x23c   : > { %1980 = vpow2.f32 %v1186_v41  ;;  %v1518_v41 = vor.u32 1.1754944e-38, %v1517_v40 }
 0x23d   : > { %1982 = vpow2.f32 %v1188_v51  ;;  %v1532_v29 = vand.u32 2147483648, %v1243_v50  ;;  %vm1526_vm5 = vweird.f32 %v1243_v50  ;;  %v1530_v23 = vand.u32 2147483647, %v1243_v50 }
 0x23e   : > { %1984 = vpow2.f32 %v1190_v52 }
 0x23f   : > { %1986 = vpow2.f32 %v1192_v54  ;;  %v1533_v48 = vor.u32 1.1754944e-38, %v1532_v29  ;;  %vm1531_vm8 = vcmp.eq.f32.partialorder %v1530_v23, 8.507059e+37  ;;  %v2484_v54 = vadd.f32 %v1294_v26, %v1293_v14 }
 0x240   : > { %1988 = vrcp.f32 %v1243_v50 }
 0x241   : > { %1990 = vrcp.f32 %v1230_v25 }
 0x242   : > { %v1981_v45 = vpop.eup %1980 }
 0x243   : > { %v1983_v3 = vpop.eup %1982  ;;  %v1270_v55 = vsel %vm1017_vm1, %v1981_v45, 0.0 }
 0x244   : > { %v1985_v57 = vpop.eup %1984  ;;  %v1271_v58 = vsel %vm1017_vm1, %v1983_v3, 0.0 }
 0x245   : > { %v1987_v8 = vpop.eup %1986  ;;  %v1272_v59 = vadd.f32 %v1271_v58, %v1270_v55  ;;  %v1273_v44 = vsel %vm1017_vm1, %v1985_v57, 0.0  ;;  %v1316_v58 = vrot.slane %v2453_v0, 4 }
 0x246   : > { %1429 = vmatpush.msra.mxu0 %v1987_v8  ;;  %v1275_v61 = vsel %vm1017_vm1, %v1987_v8, 0.0  ;;  %v1989_v17 = vpop.eup %1988 }
 0x247   : > { %v1274_v60 = vadd.f32 %v1273_v44, %v1272_v59  ;;  %v1991_v43 = vpop.eup %1990  ;;  %v1522_v7 = vmul.f32 %v1989_v17, %v1243_v50  ;;  %vm1527_vm2 = vweird.f32 %v1989_v17  ;;  %v1303_v59 = vrot.slane %v2438_v33, 4 }
 0x248   : > { %1430 = vmatpush.msra.mxu0 %v1985_v57  ;;  %v1507_v22 = vmul.f32 %v1991_v43, %v1230_v25  ;;  %vm1512_vm4 = vweird.f32 %v1991_v43  ;;  %vm1528_vm6 = vmor %vm1526_vm5, %vm1527_vm2 }
 0x249   : > { %v2464_v2 = vadd.f32 %v1275_v61, %v1274_v60  ;;  %v1523_v20 = vsub.f32 1.0, %v1522_v7  ;;  %vm1513_vm7 = vmor %vm1511_vm3, %vm1512_vm4  ;;  %v1317_v60 = vadd.f32 %v1316_v58, %v2453_v0  ;;  %v1304_v5 = vadd.f32 %v1303_v59, %v2438_v33  ;;  %v243_v58 = vld [vmem:[%s2574_s4] sm:$0xff] }
 0x24a   : > { %1431 = vmatpush.msra.mxu0 %v1983_v3  ;;  %v1508_v37 = vsub.f32 1.0, %v1507_v22  ;;  %vm1586_vm4 = vweird.f32 %v2484_v54  ;;  %1628 = vperm.xlu2 %1923, %v243_v58  }
 0x24b   : > { %v1524_v15 = vmul.f32 %v1989_v17, %v1523_v20  ;;  %v1318_v9 = vrot.slane %v1317_v60, 2  ;;  %v1305_v12 = vrot.slane %v1304_v5, 2  ;;  %v1277_v24 = vrot.slane %v2464_v2, 4 }
 0x24c   : > { %1432 = vmatpush.msra.mxu0 %v1981_v45  ;;  %v1509_v49 = vmul.f32 %v1991_v43, %v1508_v37 }
 0x24d   : > { %1864 = vmatmul.msk.f32.vlgmr.msra.gmra.mxu0 %vm1017_vm1, %v2249_v21  ;;  %v1265_v21 = vadd.f32 %v1264_v35, %v2408_v18  ;;  %v1255_v18 = vrot.slane %v1254_v34, 1  ;;  %v1525_v42 = vadd.f32 %v1989_v17, %v1524_v15  ;;  %v1319_v16 = vadd.f32 %v1318_v9, %v1317_v60 }
 0x24e   : > { %v1510_v28 = vadd.f32 %v1991_v43, %v1509_v49  ;;  %v1306_v25 = vadd.f32 %v1305_v12, %v1304_v5  ;;  %v1592_v49 = vand.u32 2147483648, %v2484_v54 }
 0x24f   : > { %v1266_v27 = vrot.slane %v1265_v21, 2  ;;  %v2480_v38 = vadd.f32 %v1255_v18, %v1254_v34  ;;  %v1529_v47 = vsel %vm1528_vm6, %v1989_v17, %v1525_v42  ;;  %v1320_v56 = vrot.slane %v1319_v16, 1 }
 0x250   : > { %v1514_v30 = vsel %vm1513_vm7, %v1991_v43, %v1510_v28  ;;  %v1534_v52 = vsel %vm1531_vm8, %v1533_v48, %v1529_v47  ;;  %v1307_v62 = vrot.slane %v1306_v25, 1  ;;  %v1593_v23 = vor.u32 1.1754944e-38, %v1592_v49 }
 0x251   : > { %v1267_v36 = vadd.f32 %v1266_v27, %v1265_v21  ;;  %v1519_v3 = vsel %vm1516_vm9, %v1518_v41, %v1514_v30  ;;  %v1547_v17 = vand.u32 2147483648, %v2480_v38  ;;  %vm1541_vm14 = vweird.f32 %v2480_v38 }
 0x252   : > { %v1545_v27 = vand.u32 2147483647, %v2480_v38  ;;  %v2513_v20 = vadd.f32 %v1320_v56, %v1319_v16  ;;  %v1308_v14 = vadd.f32 %v1307_v62, %v1306_v25  ;;  %vm1631_vm7 = vcmask 130048  }
 0x253   : > { %v1268_v63 = vrot.slane %v1267_v36, 1  ;;  %v1548_v37 = vor.u32 1.1754944e-38, %v1547_v17 }
 0x254   : > { %vm1546_vm3 = vcmp.eq.f32.partialorder %v1545_v27, 8.507059e+37  ;;  %v1622_v59 = vand.u32 2147483648, %v2513_v20  ;;  %v1620_v60 = vand.u32 2147483647, %v2513_v20 }
 0x255   : > { %v2478_v53 = vadd.f32 %v1268_v63, %v1267_v36 }
 0x256   : > { %v1623_v9 = vor.u32 1.1754944e-38, %v1622_v59 }
 0x257   : > { %1992 = vrcp.f32 %v2478_v53  ;;  %v1562_v0 = vand.u32 2147483648, %v2478_v53  ;;  %vm1556_vm12 = vweird.f32 %v2478_v53  ;;  %v1560_v33 = vand.u32 2147483647, %v2478_v53 }
 0x258   : > { %1994 = vrcp.f32 %v2480_v38 }
 0x259   : > { %1996 = vrcp.f32 %v2484_v54  ;;  %v1563_v22 = vor.u32 1.1754944e-38, %v1562_v0  ;;  %vm1561_vm0 = vcmp.eq.f32.partialorder %v1560_v33, 8.507059e+37 }
 0x25a   : > { %1998 = vrcp.f32 %v2513_v20 }
 0x25b   : > { %2000 = vrcp.f32 %v1308_v14 }
 0x25d   : > { %v1993_v55 = vpop.eup %1992 }
 0x25e   : > { %v1995_v8 = vpop.eup %1994  ;;  %v1552_v44 = vmul.f32 %v1993_v55, %v2478_v53  ;;  %vm1557_vm10 = vweird.f32 %v1993_v55  ;;  %v1590_v53 = vand.u32 2147483647, %v2484_v54 }
 0x25f   : > { %v1537_v61 = vmul.f32 %v1995_v8, %v2480_v38  ;;  %v1997_v4 = vpop.eup %1996  ;;  %vm1542_vm11 = vweird.f32 %v1995_v8  ;;  %vm2498_vm13 = vmor %vm1556_vm12, %vm1557_vm10  ;;  %v1278_v38 = vadd.f32 %v1277_v24, %v2464_v2  ;;  %vm1616_vm10 = vweird.f32 %v2513_v20 }
 0x260   : > { %v1553_v6 = vsub.f32 1.0, %v1552_v44  ;;  %v1582_v11 = vmul.f32 %v1997_v4, %v2484_v54  ;;  %vm2506_vm15 = vmor %vm1541_vm14, %vm1542_vm11  ;;  %vm1587_vm2 = vweird.f32 %v1997_v4  ;;  %vm1591_vm6 = vcmp.eq.f32.partialorder %v1590_v53, 8.507059e+37  ;;  %v1999_v48 = vpop.eup %1998 }
 0x261   : > { %v1538_v1 = vsub.f32 1.0, %v1537_v61  ;;  %vm1588_vm5 = vmor %vm1586_vm4, %vm1587_vm2  ;;  %v1279_v26 = vrot.slane %v1278_v38, 2  ;;  %v2001_v30 = vpop.eup %2000  ;;  %v1612_v2 = vmul.f32 %v1999_v48, %v2513_v20  ;;  %vm1617_vm8 = vweird.f32 %v1999_v48 }
 0x262   : > { %v1554_v13 = vmul.f32 %v1993_v55, %v1553_v6  ;;  %v1583_v50 = vsub.f32 1.0, %v1582_v11  ;;  %v1597_v41 = vmul.f32 %v2001_v30, %v1308_v14  ;;  %vm1602_vm9 = vweird.f32 %v2001_v30  ;;  %vm1618_vm11 = vmor %vm1616_vm10, %vm1617_vm8 }
 0x263   : > { %v1539_v31 = vmul.f32 %v1995_v8, %v1538_v1  ;;  %v1607_v61 = vand.u32 2147483648, %v1308_v14  ;;  %vm1601_vm12 = vweird.f32 %v1308_v14  ;;  %vm1621_vm14 = vcmp.eq.f32.partialorder %v1620_v60, 8.507059e+37 }
 0x264   : > { %v1555_v35 = vadd.f32 %v1993_v55, %v1554_v13  ;;  %v1584_v43 = vmul.f32 %v1997_v4, %v1583_v50  ;;  %v1598_v54 = vsub.f32 1.0, %v1597_v41 }
 0x265   : > { %v1540_v21 = vadd.f32 %v1995_v8, %v1539_v31  ;;  %v1608_v12 = vor.u32 1.1754944e-38, %v1607_v61 }
 0x266   : > { %v1559_v7 = vsel %vm2498_vm13, %v1993_v55, %v1555_v35  ;;  %v1585_v15 = vadd.f32 %v1997_v4, %v1584_v43  ;;  %v1599_v55 = vmul.f32 %v2001_v30, %v1598_v54  ;;  %vm1603_vm13 = vmor %vm1601_vm12, %vm1602_vm9 }
 0x267   : > { %v1544_v36 = vsel %vm2506_vm15, %v1995_v8, %v1540_v21  ;;  %v1564_v63 = vsel %vm1561_vm0, %v1563_v22, %v1559_v7 }
 0x268   : > { %v1549_v42 = vsel %vm1546_vm3, %v1548_v37, %v1544_v36  ;;  %v1589_v28 = vsel %vm1588_vm5, %v1997_v4, %v1585_v15  ;;  %v1600_v44 = vadd.f32 %v2001_v30, %v1599_v55  ;;  %v1605_v4 = vand.u32 2147483647, %v1308_v14 }
 0x269   : > { %v1594_v46 = vsel %vm1591_vm6, %v1593_v23, %v1589_v28 }
 0x26a   : > { %v1604_v1 = vsel %vm1603_vm13, %v2001_v30, %v1600_v44  ;;  %vm1606_vm15 = vcmp.eq.f32.partialorder %v1605_v4, 8.507059e+37 }
 0x26b   : > { %v1609_v25 = vsel %vm1606_vm15, %v1608_v12, %v1604_v1 }
 0x275   : > { %v1342_v32 = vpop.f32.mrf.mxu0 }
 0x276   : > { %v1520_v57 = vmul.f32 %v1519_v3, %v1342_v32  ;;  %v1388_v34 = vpop.f32.mrf.mxu2  ;;  %v1280_v32 = vadd.f32 %v1279_v26, %v1278_v38 }
 0x277   : > { %v1550_v29 = vmul.f32 %v1549_v42, %v1388_v34 }
 0x27e   : > { %v1365_v51 = vpop.f32.mrf.mxu1 }
 0x27f   : > { %v1535_v45 = vmul.f32 %v1534_v52, %v1365_v51  ;;  %v1281_v51 = vrot.slane %v1280_v32, 1  ;;  %v1613_v52 = vsub.f32 1.0, %v1612_v2 }
 0x281   : > { %1649 = vmatpush.msrb.mxu0 %v1535_v45  ;;  %v1282_v45 = vadd.f32 %v1281_v51, %v1280_v32  ;;  %v1614_v3 = vmul.f32 %v1999_v48, %v1613_v52 }
 0x283   : > { %1650 = vmatpush.msrb.mxu0 %v1520_v57  ;;  %v242_v57 = vld [vmem:[%s2573_s3] sm:$0xff]  ;;  %2002 = vrcp.f32 %v1282_v45  ;;  %v1615_v8 = vadd.f32 %v1999_v48, %v1614_v3  ;;  %v1577_v33 = vand.u32 2147483648, %v1282_v45  ;;  %vm1571_vm2 = vweird.f32 %v1282_v45 }
 0x284   : > { %1868 = vmatmul.msk.f32.vlgmr.msrb.gmra.mxu0 %vm1631_vm7, %v242_v57  ;;  %v1575_v17 = vand.u32 2147483647, %v1282_v45 }
 0x285   : > { %v1619_v5 = vsel %vm1618_vm11, %v1999_v48, %v1615_v8  ;;  %v1578_v43 = vor.u32 1.1754944e-38, %v1577_v33 }
 0x286   : > { %v1624_v16 = vsel %vm1621_vm14, %v1623_v9, %v1619_v5  ;;  %vm1576_vm4 = vcmp.eq.f32.partialorder %v1575_v17, 8.507059e+37 }
 0x289   : > { %v2003_v6 = vpop.eup %2002 }
 0x28a   : > { %v1567_v50 = vmul.f32 %v2003_v6, %v1282_v45  ;;  %vm1572_vm0 = vweird.f32 %v2003_v6 }
 0x28b   : > { %vm1573_vm3 = vmor %vm1571_vm2, %vm1572_vm0 }
 0x28c   : > { %v1568_v0 = vsub.f32 1.0, %v1567_v50 }
 0x28e   : > { %v1569_v56 = vmul.f32 %v2003_v6, %v1568_v0 }
 0x290   : > { %v1570_v21 = vadd.f32 %v2003_v6, %v1569_v56 }
 0x292   : > { %v1574_v10 = vsel %vm1573_vm3, %v2003_v6, %v1570_v21 }
 0x293   : > { %v1579_v27 = vsel %vm1576_vm4, %v1578_v43, %v1574_v10 }
 0x297   : > { %v1411_v39 = vpop.f32.mrf.mxu3 }
 0x298   : > { %v1565_v18 = vmul.f32 %v1564_v63, %v1411_v39 }
 0x29a   : > { %1669 = vmatpush.msrb.mxu1 %v1565_v18 }
 0x29c   : > { %1670 = vmatpush.msrb.mxu1 %v1550_v29 }
 0x29d   : > { %1869 = vmatmul.msk.f32.vlgmr.msrb.gmra.mxu1 %vm1631_vm7, %v242_v57 }
 0x29e   : > { %v1457_v40 = vpop.f32.mrf.mxu1 }
 0x29f   : > { %v1595_v47 = vmul.f32 %v1594_v46, %v1457_v40 }
 0x2a1   : > { %1689 = vmatpush.msrb.mxu2 %v1595_v47 }
 0x2a4   : > { %v1629_v19 = vpop.permute.xlu2 %1628 }
 0x2a9   : > { %v1480_v11 = vpop.f32.mrf.mxu2 }
 0x2aa   : > { %v1610_v35 = vmul.f32 %v1609_v25, %v1480_v11 }
 0x2b6   : > { %v1503_v13 = vpop.f32.mrf.mxu3 }
 0x2b7   : > { %v1625_v31 = vmul.f32 %v1624_v16, %v1503_v13 }
 0x2b9   : > { %1709 = vmatpush.msrb.mxu3 %v1625_v31 }
 0x2bb   : > { %1710 = vmatpush.msrb.mxu3 %v1610_v35 }
 0x2bc   : > { %1871 = vmatmul.msk.f32.vlgmr.msrb.gmra.mxu3 %vm1631_vm7, %v242_v57 }
 0x2ca   : > { %v1434_v62 = vpop.f32.mrf.mxu0 }
 0x2cb   : > { %v1580_v7 = vmul.f32 %v1579_v27, %v1434_v62 }
 0x2cd   : > { %1690 = vmatpush.msrb.mxu2 %v1580_v7 }
 0x2ce   : > { %1870 = vmatmul.msk.f32.vlgmr.msrb.gmra.mxu2 %vm1631_vm7, %v242_v57 }
 0x301   : > { %v1652_v22 = vpop.f32.mrf.mxu0 }
 0x302   : > { %v1653_v36 = vadd.f32 %v1652_v22, %v1629_v19 }
 0x304   : > { %1715 = vst.msk [vmem:[%s218_s8] sm:$0xff] %vm1017_vm1, %v1653_v36 }
 0x31a   : > { %v1672_v24 = vpop.f32.mrf.mxu1 }
 0x31b   : > { %v1673_v20 = vadd.f32 %v1672_v24, %v1629_v19 }
 0x31d   : > { %1716 = vst.msk [vmem:[%s218_s8 + $0x8] sm:$0xff] %vm1017_vm1, %v1673_v20 }
 0x33f   : > { %v1712_v34 = vpop.f32.mrf.mxu3 }
 0x340   : > { %v1713_v37 = vadd.f32 %v1712_v34, %v1629_v19 }
 0x342   : > { %1718 = vst.msk [vmem:[%s218_s8 + $0x18] sm:$0xff] %vm1017_vm1, %v1713_v37 }
 0x351   : > { %v1692_v39 = vpop.f32.mrf.mxu2 }
 0x352   : > { %v1693_v63 = vadd.f32 %v1692_v39, %v1629_v19 }
 0x354   : > { %1717 = vst.msk [vmem:[%s218_s8 + $0x10] sm:$0xff] %vm1017_vm1, %v1693_v63 }
 0x355   : > { %2031 = shalt.err (!%p2028_p3)
}
 0x356   : > { %s2069_s6 = smov 128   ;;  %s2070_s7 = smov 8  }
 0x357   : > { %1878 = dma.vmem_to_hbm [thread:$0]  (%p2139_p5), %s1733_s13, 512, %s1735_s14, %s1720_s15, %s2069_s6, %s2069_s6, %s2070_s7  }
 0x358 PF: > { %p1884_p4 = scmp.ge.s32.totalorder %s2066_s21, 2  ;;  %s1749_s8 = sand.u32 1, %s2054_s18  }
 0x359   : > { %s1750_s9 = scalar_lea.sflag [#allocation3], %s1749_s8 }
 0x35a   : > { %p1881_p7 = pnand %p1884_p4, %p2143_p6 }
 0x35c   : > { %p1882_p8 = pneg %p1881_p7 }
 0x35e   : > { %2049 = dma.done.wait (%p1882_p8), %s1750_s9, 512  }
 0x35f   : > { %2051 = vsyncadd (%p1882_p8), %s1750_s9, 4294966784  ;;  %p15_p9 = scmp.ge.s32.totalorder %s2126_s24, 4   ;;  %s2582_s18 = smov %s2058_s19 }
 0x360   : > { %s2583_s19 = smov %s2062_s20  ;;  %s2584_s20 = smov %s2137_s27 }
 0x361   : > { %s2585_s21 = smov %s2126_s24  ;;  %17 = sbr.rel (!%p15_p9) target bundleno = 3 (0x3), region = 75 }
 0x366   :  { %1756 = vsyncpa [#allocation3], 1 }
 0x367   :  { %1758 = vsyncpa [#allocation3 + $0x1], 1 }

</bundles_post_ra>
